<compile_context>
chip_gen: v5e
topology: v5e:2x2
jax: 0.10.0
libtpu: 0.0.40
codegen_flags: <defaults>
</compile_context>

<pallas_src>
import functools
import math

import jax
import jax.numpy as jnp
from jax.experimental import pallas as pl


# ----------------------------- fused Pallas kernel ---------------------------

def _mha_fused_kernel(x_ref, wqkv_ref, bqkv_ref, wproj_ref, bproj_ref, o_ref,
                      *, B, T, H):
    # x_ref:     (B*T, C)   flattened tokens
    # wqkv_ref:  (C, 3C)    c_attn weight, natural [Q | K | V] column order
    # bqkv_ref:  (1, 3C)    c_attn bias row
    # wproj_ref: (C, C)     c_proj weight (rows head-major, as in PyTorch)
    # bproj_ref: (1, C)
    # o_ref:     (B*T, C)
    BT, C = x_ref.shape
    D = C // H
    scale = 1.0 / math.sqrt(D)

    x = x_ref[...]                                                # (B*T, C)

    # --- fused c_attn: one MXU pass, N = 3C output lanes ---------------------
    qkv = jnp.dot(x, wqkv_ref[...],
                  preferred_element_type=jnp.float32) + bqkv_ref[...]   # (B*T, 3C)
    # Leading-dim split only (last dim unchanged; T == 8 keeps it tile-aligned).
    qkv = qkv.reshape(B, T, 3 * C)

    # --- per-head attention (static unroll; q/k/v are static lane slices) ----
    ys = []
    for h in range(H):
        q = qkv[:, :, h * D:(h + 1) * D] * scale                  # (B, T, D)
        k = qkv[:, :, C + h * D:C + (h + 1) * D]                  # (B, T, D)
        v = qkv[:, :, 2 * C + h * D:2 * C + (h + 1) * D]          # (B, T, D)

        s = jnp.einsum("bqd,bkd->bqk", q, k,
                       preferred_element_type=jnp.float32)        # (B, T, T)
        m = jnp.max(s, axis=-1, keepdims=True)
        p = jnp.exp(s - m)
        l = jnp.sum(p, axis=-1, keepdims=True)
        # Approx reciprocal runs on the EUP slot; covered by the 5e-3 check
        # tolerance below (use `p / l` where exact softmax parity is required).
        p = p * pl.reciprocal(l, approx=True)
        # TODO(synk): attn_dropout omitted (dropout p = 0.0 / eval mode)
        ys.append(jnp.einsum("bqk,bkd->bqd", p, v,
                             preferred_element_type=jnp.float32))  # (B, T, D)

    # Head-major lane concat == PyTorch's transpose(1,2).view(B,T,C) layout,
    # so w_proj needs no re-layout and c_proj is one matmul with K = H*D = C.
    y = jnp.concatenate(ys, axis=-1).reshape(BT, C)               # (B*T, C)

    out = jnp.dot(y, wproj_ref[...],
                  preferred_element_type=jnp.float32) + bproj_ref[...]
    # TODO(synk): resid_dropout omitted (dropout p = 0.0 / eval mode)
    o_ref[...] = out.astype(o_ref.dtype)


# ----------------------------- wrapper ---------------------------------------

def multi_head_attention(x, params, n_head):
    """Forward pass equivalent to the PyTorch MultiHeadAttention module."""
    B, T, C = x.shape
    x2d = x.reshape(B * T, C)                       # free: merges leading dims
    b_qkv = params["b_attn"].reshape(1, 3 * C)      # single bias row
    b_proj = params["b_proj"].reshape(1, C)

    kernel = functools.partial(_mha_fused_kernel, B=B, T=T, H=n_head)
    out = pl.pallas_call(
        kernel,
        out_shape=jax.ShapeDtypeStruct((B * T, C), jnp.float32),
        # No grid / no BlockSpecs: a single invocation with every operand
        # whole-array resident in VMEM (~20 KiB total).  This removes the
        # serial per-step grid overhead that dominated on single-TC v5e/v6e.
        # At production T/C, re-introduce a ("parallel",) batch / query-tile
        # axis for v7x's 2 TCs and a KV reduction axis with online softmax.
    )(x2d, params["w_attn"], b_qkv, params["w_proj"], b_proj)
    return out.reshape(B, T, C)


# ----------------------------- reference (plain JAX) -------------------------

def _reference(x, params, n_head):
    B, T, C = x.shape
    D = C // n_head
    hp = jax.lax.Precision.HIGHEST
    qkv = jnp.dot(x.reshape(B * T, C), params["w_attn"], precision=hp) + params["b_attn"]
    qkv = qkv.reshape(B, T, 3 * C)
    q = qkv[..., :C].reshape(B, T, n_head, D).transpose(0, 2, 1, 3)
    k = qkv[..., C:2 * C].reshape(B, T, n_head, D).transpose(0, 2, 1, 3)
    v = qkv[..., 2 * C:].reshape(B, T, n_head, D).transpose(0, 2, 1, 3)
    att = jnp.einsum("bhqd,bhkd->bhqk", q, k, precision=hp) * (1.0 / math.sqrt(D))
    att = jax.nn.softmax(att, axis=-1)
    y = jnp.einsum("bhqk,bhkd->bhqd", att, v, precision=hp)
    y = y.transpose(0, 2, 1, 3).reshape(B * T, C)
    out = jnp.dot(y, params["w_proj"], precision=hp) + params["b_proj"]
    return out.reshape(B, T, C)


# ----------------------------- main -------------------------------------------

if __name__ == "__main__":
    # config: n_embd=32, n_head=4, dropout=0.0; input B=2, T=8
    B, T, C, H = 2, 8, 32, 4

    key = jax.random.PRNGKey(0)
    k_x, k_wa, k_ba, k_wp, k_bp = jax.random.split(key, 5)

    x = jax.random.normal(k_x, (B, T, C), dtype=jnp.float32)

    # Deterministic parameter init (PyTorch Linear-style uniform bounds).
    bound = 1.0 / math.sqrt(C)
    params = {
        # stored as (in, out) so kernels compute x @ W (equivalent to x @ W_pt.T)
        "w_attn": jax.random.uniform(k_wa, (C, 3 * C), jnp.float32, -bound, bound),
        "b_attn": jax.random.uniform(k_ba, (3 * C,), jnp.float32, -bound, bound),
        "w_proj": jax.random.uniform(k_wp, (C, C), jnp.float32, -bound, bound),
        "b_proj": jax.random.uniform(k_bp, (C,), jnp.float32, -bound, bound),
    }

    mha = jax.jit(multi_head_attention, static_argnums=2)
    out = jax.block_until_ready(mha(x, params, H))

    ref = _reference(x, params, H)
    assert out.shape == (B, T, C)
    # Tolerance covers the approx (EUP) reciprocal in the softmax epilogue.
    assert jnp.allclose(out, ref, atol=5e-3, rtol=5e-3), float(jnp.max(jnp.abs(out - ref)))

    print("KERNEL_OK")
</pallas_src>

<mosaic_0001>
module attributes {stable_mosaic.version = 11 : i64} {
  func.func @_mha_fused_kernel(%arg0: memref<16x32xf32, #tpu.memory_space<vmem>>, %arg1: memref<32x96xf32, #tpu.memory_space<vmem>>, %arg2: memref<1x96xf32, #tpu.memory_space<vmem>>, %arg3: memref<32x32xf32, #tpu.memory_space<vmem>>, %arg4: memref<1x32xf32, #tpu.memory_space<vmem>>, %arg5: memref<16x32xf32, #tpu.memory_space<vmem>>) attributes {dimension_semantics = [], scalar_prefetch = 0 : i64, scratch_operands = 0 : i64, tpu.core_type = #tpu.core_type<tc>} {
    %c0 = arith.constant 0 : index
    %c0_0 = arith.constant 0 : index
    %0 = vector.load %arg0[%c0, %c0_0] : memref<16x32xf32, #tpu.memory_space<vmem>>, vector<16x32xf32>
    %c0_1 = arith.constant 0 : index
    %c0_2 = arith.constant 0 : index
    %1 = vector.load %arg1[%c0_1, %c0_2] : memref<32x96xf32, #tpu.memory_space<vmem>>, vector<32x96xf32>
    %cst = arith.constant dense<0.000000e+00> : vector<16x96xf32>
    %2 = tpu.matmul %0, %1, %cst {dimension_numbers = #tpu.dot_dimension_numbers<[1], [0], [0], [1], [0, 0, 1, 1], [], []>} : vector<16x32xf32>, vector<32x96xf32>, vector<16x96xf32> -> vector<16x96xf32>
    %c0_3 = arith.constant 0 : index
    %c0_4 = arith.constant 0 : index
    %3 = vector.load %arg2[%c0_3, %c0_4] : memref<1x96xf32, #tpu.memory_space<vmem>>, vector<1x96xf32>
    %4 = vector.broadcast %3 : vector<1x96xf32> to vector<16x96xf32>
    %5 = arith.addf %2, %4 : vector<16x96xf32>
    %6 = vector.shape_cast %5 : vector<16x96xf32> to vector<2x8x96xf32>
    %7 = vector.extract_strided_slice %6 {offsets = [0, 0, 0], sizes = [2, 8, 8], strides = [1, 1, 1]} : vector<2x8x96xf32> to vector<2x8x8xf32>
    %cst_5 = arith.constant 0.353553385 : f32
    %8 = vector.broadcast %cst_5 : f32 to vector<2x8x8xf32>
    %9 = arith.mulf %7, %8 : vector<2x8x8xf32>
    %10 = vector.extract_strided_slice %6 {offsets = [0, 0, 32], sizes = [2, 8, 8], strides = [1, 1, 1]} : vector<2x8x96xf32> to vector<2x8x8xf32>
    %11 = vector.extract_strided_slice %6 {offsets = [0, 0, 64], sizes = [2, 8, 8], strides = [1, 1, 1]} : vector<2x8x96xf32> to vector<2x8x8xf32>
    "tpu.trace_start"() <{level = 10 : i32, message = "bqd,bkd->bqk"}> : () -> ()
    %cst_6 = arith.constant dense<0.000000e+00> : vector<2x8x8xf32>
    %12 = tpu.matmul %9, %10, %cst_6 {dimension_numbers = #tpu.dot_dimension_numbers<[2], [2], [1], [1], [0, 0, 0, 1, 1, 1], [0], [0]>} : vector<2x8x8xf32>, vector<2x8x8xf32>, vector<2x8x8xf32> -> vector<2x8x8xf32>
    "tpu.trace_stop"() : () -> ()
    %cst_7 = arith.constant dense<0xFF800000> : vector<2x8xf32>
    %13 = vector.multi_reduction <maximumf>, %12, %cst_7 [2] : vector<2x8x8xf32> to vector<2x8xf32>
    %14 = vector.shape_cast %13 : vector<2x8xf32> to vector<2x8x1xf32>
    %15 = vector.broadcast %14 : vector<2x8x1xf32> to vector<2x8x8xf32>
    %16 = arith.subf %12, %15 : vector<2x8x8xf32>
    %17 = math.exp %16 : vector<2x8x8xf32>
    %cst_8 = arith.constant dense<0.000000e+00> : vector<2x8xf32>
    %18 = vector.multi_reduction <add>, %17, %cst_8 [2] : vector<2x8x8xf32> to vector<2x8xf32>
    %19 = vector.shape_cast %18 : vector<2x8xf32> to vector<2x8x1xf32>
    %20 = tpu.reciprocal %19 {approx = true} : vector<2x8x1xf32> -> vector<2x8x1xf32>
    %21 = vector.broadcast %20 : vector<2x8x1xf32> to vector<2x8x8xf32>
    %22 = arith.mulf %17, %21 : vector<2x8x8xf32>
    "tpu.trace_start"() <{level = 10 : i32, message = "bqk,bkd->bqd"}> : () -> ()
    %cst_9 = arith.constant dense<0.000000e+00> : vector<2x8x8xf32>
    %23 = tpu.matmul %22, %11, %cst_9 {dimension_numbers = #tpu.dot_dimension_numbers<[2], [1], [1], [2], [0, 0, 0, 1, 1, 2], [0], [0]>} : vector<2x8x8xf32>, vector<2x8x8xf32>, vector<2x8x8xf32> -> vector<2x8x8xf32>
    "tpu.trace_stop"() : () -> ()
    %24 = vector.extract_strided_slice %6 {offsets = [0, 0, 8], sizes = [2, 8, 8], strides = [1, 1, 1]} : vector<2x8x96xf32> to vector<2x8x8xf32>
    %cst_10 = arith.constant 0.353553385 : f32
    %25 = vector.broadcast %cst_10 : f32 to vector<2x8x8xf32>
    %26 = arith.mulf %24, %25 : vector<2x8x8xf32>
    %27 = vector.extract_strided_slice %6 {offsets = [0, 0, 40], sizes = [2, 8, 8], strides = [1, 1, 1]} : vector<2x8x96xf32> to vector<2x8x8xf32>
    %28 = vector.extract_strided_slice %6 {offsets = [0, 0, 72], sizes = [2, 8, 8], strides = [1, 1, 1]} : vector<2x8x96xf32> to vector<2x8x8xf32>
    "tpu.trace_start"() <{level = 10 : i32, message = "bqd,bkd->bqk"}> : () -> ()
    %cst_11 = arith.constant dense<0.000000e+00> : vector<2x8x8xf32>
    %29 = tpu.matmul %26, %27, %cst_11 {dimension_numbers = #tpu.dot_dimension_numbers<[2], [2], [1], [1], [0, 0, 0, 1, 1, 1], [0], [0]>} : vector<2x8x8xf32>, vector<2x8x8xf32>, vector<2x8x8xf32> -> vector<2x8x8xf32>
    "tpu.trace_stop"() : () -> ()
    %cst_12 = arith.constant dense<0xFF800000> : vector<2x8xf32>
    %30 = vector.multi_reduction <maximumf>, %29, %cst_12 [2] : vector<2x8x8xf32> to vector<2x8xf32>
    %31 = vector.shape_cast %30 : vector<2x8xf32> to vector<2x8x1xf32>
    %32 = vector.broadcast %31 : vector<2x8x1xf32> to vector<2x8x8xf32>
    %33 = arith.subf %29, %32 : vector<2x8x8xf32>
    %34 = math.exp %33 : vector<2x8x8xf32>
    %cst_13 = arith.constant dense<0.000000e+00> : vector<2x8xf32>
    %35 = vector.multi_reduction <add>, %34, %cst_13 [2] : vector<2x8x8xf32> to vector<2x8xf32>
    %36 = vector.shape_cast %35 : vector<2x8xf32> to vector<2x8x1xf32>
    %37 = tpu.reciprocal %36 {approx = true} : vector<2x8x1xf32> -> vector<2x8x1xf32>
    %38 = vector.broadcast %37 : vector<2x8x1xf32> to vector<2x8x8xf32>
    %39 = arith.mulf %34, %38 : vector<2x8x8xf32>
    "tpu.trace_start"() <{level = 10 : i32, message = "bqk,bkd->bqd"}> : () -> ()
    %cst_14 = arith.constant dense<0.000000e+00> : vector<2x8x8xf32>
    %40 = tpu.matmul %39, %28, %cst_14 {dimension_numbers = #tpu.dot_dimension_numbers<[2], [1], [1], [2], [0, 0, 0, 1, 1, 2], [0], [0]>} : vector<2x8x8xf32>, vector<2x8x8xf32>, vector<2x8x8xf32> -> vector<2x8x8xf32>
    "tpu.trace_stop"() : () -> ()
    %41 = vector.extract_strided_slice %6 {offsets = [0, 0, 16], sizes = [2, 8, 8], strides = [1, 1, 1]} : vector<2x8x96xf32> to vector<2x8x8xf32>
    %cst_15 = arith.constant 0.353553385 : f32
    %42 = vector.broadcast %cst_15 : f32 to vector<2x8x8xf32>
    %43 = arith.mulf %41, %42 : vector<2x8x8xf32>
    %44 = vector.extract_strided_slice %6 {offsets = [0, 0, 48], sizes = [2, 8, 8], strides = [1, 1, 1]} : vector<2x8x96xf32> to vector<2x8x8xf32>
    %45 = vector.extract_strided_slice %6 {offsets = [0, 0, 80], sizes = [2, 8, 8], strides = [1, 1, 1]} : vector<2x8x96xf32> to vector<2x8x8xf32>
    "tpu.trace_start"() <{level = 10 : i32, message = "bqd,bkd->bqk"}> : () -> ()
    %cst_16 = arith.constant dense<0.000000e+00> : vector<2x8x8xf32>
    %46 = tpu.matmul %43, %44, %cst_16 {dimension_numbers = #tpu.dot_dimension_numbers<[2], [2], [1], [1], [0, 0, 0, 1, 1, 1], [0], [0]>} : vector<2x8x8xf32>, vector<2x8x8xf32>, vector<2x8x8xf32> -> vector<2x8x8xf32>
    "tpu.trace_stop"() : () -> ()
    %cst_17 = arith.constant dense<0xFF800000> : vector<2x8xf32>
    %47 = vector.multi_reduction <maximumf>, %46, %cst_17 [2] : vector<2x8x8xf32> to vector<2x8xf32>
    %48 = vector.shape_cast %47 : vector<2x8xf32> to vector<2x8x1xf32>
    %49 = vector.broadcast %48 : vector<2x8x1xf32> to vector<2x8x8xf32>
    %50 = arith.subf %46, %49 : vector<2x8x8xf32>
    %51 = math.exp %50 : vector<2x8x8xf32>
    %cst_18 = arith.constant dense<0.000000e+00> : vector<2x8xf32>
    %52 = vector.multi_reduction <add>, %51, %cst_18 [2] : vector<2x8x8xf32> to vector<2x8xf32>
    %53 = vector.shape_cast %52 : vector<2x8xf32> to vector<2x8x1xf32>
    %54 = tpu.reciprocal %53 {approx = true} : vector<2x8x1xf32> -> vector<2x8x1xf32>
    %55 = vector.broadcast %54 : vector<2x8x1xf32> to vector<2x8x8xf32>
    %56 = arith.mulf %51, %55 : vector<2x8x8xf32>
    "tpu.trace_start"() <{level = 10 : i32, message = "bqk,bkd->bqd"}> : () -> ()
    %cst_19 = arith.constant dense<0.000000e+00> : vector<2x8x8xf32>
    %57 = tpu.matmul %56, %45, %cst_19 {dimension_numbers = #tpu.dot_dimension_numbers<[2], [1], [1], [2], [0, 0, 0, 1, 1, 2], [0], [0]>} : vector<2x8x8xf32>, vector<2x8x8xf32>, vector<2x8x8xf32> -> vector<2x8x8xf32>
    "tpu.trace_stop"() : () -> ()
    %58 = vector.extract_strided_slice %6 {offsets = [0, 0, 24], sizes = [2, 8, 8], strides = [1, 1, 1]} : vector<2x8x96xf32> to vector<2x8x8xf32>
    %cst_20 = arith.constant 0.353553385 : f32
    %59 = vector.broadcast %cst_20 : f32 to vector<2x8x8xf32>
    %60 = arith.mulf %58, %59 : vector<2x8x8xf32>
    %61 = vector.extract_strided_slice %6 {offsets = [0, 0, 56], sizes = [2, 8, 8], strides = [1, 1, 1]} : vector<2x8x96xf32> to vector<2x8x8xf32>
    %62 = vector.extract_strided_slice %6 {offsets = [0, 0, 88], sizes = [2, 8, 8], strides = [1, 1, 1]} : vector<2x8x96xf32> to vector<2x8x8xf32>
    "tpu.trace_start"() <{level = 10 : i32, message = "bqd,bkd->bqk"}> : () -> ()
    %cst_21 = arith.constant dense<0.000000e+00> : vector<2x8x8xf32>
    %63 = tpu.matmul %60, %61, %cst_21 {dimension_numbers = #tpu.dot_dimension_numbers<[2], [2], [1], [1], [0, 0, 0, 1, 1, 1], [0], [0]>} : vector<2x8x8xf32>, vector<2x8x8xf32>, vector<2x8x8xf32> -> vector<2x8x8xf32>
    "tpu.trace_stop"() : () -> ()
    %cst_22 = arith.constant dense<0xFF800000> : vector<2x8xf32>
    %64 = vector.multi_reduction <maximumf>, %63, %cst_22 [2] : vector<2x8x8xf32> to vector<2x8xf32>
    %65 = vector.shape_cast %64 : vector<2x8xf32> to vector<2x8x1xf32>
    %66 = vector.broadcast %65 : vector<2x8x1xf32> to vector<2x8x8xf32>
    %67 = arith.subf %63, %66 : vector<2x8x8xf32>
    %68 = math.exp %67 : vector<2x8x8xf32>
    %cst_23 = arith.constant dense<0.000000e+00> : vector<2x8xf32>
    %69 = vector.multi_reduction <add>, %68, %cst_23 [2] : vector<2x8x8xf32> to vector<2x8xf32>
    %70 = vector.shape_cast %69 : vector<2x8xf32> to vector<2x8x1xf32>
    %71 = tpu.reciprocal %70 {approx = true} : vector<2x8x1xf32> -> vector<2x8x1xf32>
    %72 = vector.broadcast %71 : vector<2x8x1xf32> to vector<2x8x8xf32>
    %73 = arith.mulf %68, %72 : vector<2x8x8xf32>
    "tpu.trace_start"() <{level = 10 : i32, message = "bqk,bkd->bqd"}> : () -> ()
    %cst_24 = arith.constant dense<0.000000e+00> : vector<2x8x8xf32>
    %74 = tpu.matmul %73, %62, %cst_24 {dimension_numbers = #tpu.dot_dimension_numbers<[2], [1], [1], [2], [0, 0, 0, 1, 1, 2], [0], [0]>} : vector<2x8x8xf32>, vector<2x8x8xf32>, vector<2x8x8xf32> -> vector<2x8x8xf32>
    "tpu.trace_stop"() : () -> ()
    %75 = tpu.concatenate %23, %40, %57, %74 in 2 : vector<2x8x8xf32>, vector<2x8x8xf32>, vector<2x8x8xf32>, vector<2x8x8xf32> -> vector<2x8x32xf32>
    %76 = vector.shape_cast %75 : vector<2x8x32xf32> to vector<16x32xf32>
    %c0_25 = arith.constant 0 : index
    %c0_26 = arith.constant 0 : index
    %77 = vector.load %arg3[%c0_25, %c0_26] : memref<32x32xf32, #tpu.memory_space<vmem>>, vector<32x32xf32>
    %cst_27 = arith.constant dense<0.000000e+00> : vector<16x32xf32>
    %78 = tpu.matmul %76, %77, %cst_27 {dimension_numbers = #tpu.dot_dimension_numbers<[1], [0], [0], [1], [0, 0, 1, 1], [], []>} : vector<16x32xf32>, vector<32x32xf32>, vector<16x32xf32> -> vector<16x32xf32>
    %c0_28 = arith.constant 0 : index
    %c0_29 = arith.constant 0 : index
    %79 = vector.load %arg4[%c0_28, %c0_29] : memref<1x32xf32, #tpu.memory_space<vmem>>, vector<1x32xf32>
    %80 = vector.broadcast %79 : vector<1x32xf32> to vector<16x32xf32>
    %81 = arith.addf %78, %80 : vector<16x32xf32>
    %c0_30 = arith.constant 0 : index
    %c0_31 = arith.constant 0 : index
    %82 = vector.load %arg5[%c0_30, %c0_31] : memref<16x32xf32, #tpu.memory_space<vmem>>, vector<16x32xf32>
    tpu.vector_store %arg5[%c0_30, %c0_31], %81 {strides = array<i32>} : memref<16x32xf32, #tpu.memory_space<vmem>>, vector<16x32xf32>,
    return
  }
}

</mosaic_0001>

<bundles_post_ra>
// kernel: multi_head_attention.1
= control target key start
LH: loop header
LB: loop body
LE: loop exit
PB: predicated region body
PF: predicated region fallthrough
CT: control target
= control target key end

     0   :  { %10 = vsyncpa [#allocation3], 0  ;;  %s1092_s0 = inlined_call_operand.hbm [shape: f32[16,32], index: 0, kind: input, shape index: {}]   ;;  %s1093_s1 = inlined_call_operand.hbm [shape: f32[32,96], index: 1, kind: input, shape index: {}]   ;;  %s1094_s2 = inlined_call_operand.vmem [shape: f32[1,96], index: 2, kind: input, shape index: {}]   ;;  %s1095_s3 = inlined_call_operand.hbm [shape: f32[32,32], index: 3, kind: input, shape index: {}]   ;;  %s1096_s4 = inlined_call_operand.vmem [shape: f32[1,32], index: 4, kind: input, shape index: {}]   ;;  %s1097_s5 = inlined_call_operand.hbm [shape: f32[16,32], index: 5, kind: output, shape index: {}]  }
   0x1   :  { %11 = vsyncpa [#allocation6], 0 }
   0x2   :  { %12 = vsyncpa [#allocation4], 0  ;;  %s30_s20 = sshll.u32 %s1093_s1, 4  ;;  %s915_s21 = smov [#allocation5]   ;;  %s31_s20 = int_to_ptr.hbm [resolvable:$true] %s30_s20 }
   0x3   :  { %s32_s22 = sshll.u32 %s915_s21, 4  ;;  %s17_s25 = sshll.u32 %s1092_s0, 4  ;;  %s33_s22 = int_to_ptr.vmem [resolvable:$true] %s32_s22  ;;  %s18_s25 = int_to_ptr.hbm [resolvable:$true] %s17_s25 }
   0x4   :  { %s916_s26 = smov 128   ;;  %s917_s27 = smov 8  }
   0x5   :  { %38 = dma.hbm_to_vmem [thread:$0]  %s31_s20, 512, %s33_s22, [#allocation6], %s916_s26, %s916_s26, %s917_s27  }
   0x6   :  { %s918_s28 = smov [#allocation2]   ;;  %s45_s1 = sshll.u32 %s1095_s3, 4  ;;  %s46_s1 = int_to_ptr.hbm [resolvable:$true] %s45_s1 }
   0x7   :  { %s19_s29 = sshll.u32 %s918_s28, 4  ;;  %s919_s0 = smov [#allocation7]   ;;  %s20_s29 = int_to_ptr.vmem [resolvable:$true] %s19_s29 }
   0x8   :  { %25 = dma.hbm_to_vmem [thread:$0]  %s18_s25, 256, %s20_s29, [#allocation3], %s916_s26, %s916_s26, %s917_s27  }
   0x9   :  { %s47_s7 = sshll.u32 %s919_s0, 4  ;;  %s48_s7 = int_to_ptr.vmem [resolvable:$true] %s47_s7 }
   0xa   :  { %53 = dma.hbm_to_vmem [thread:$0]  %s46_s1, 512, %s48_s7, [#allocation6], %s916_s26, %s916_s26, %s917_s27  }
   0xb   :  { %909 = dma.done.wait [#allocation3], 256  }
   0xc   :  { %910 = vsyncadd [#allocation3], 4294967040 }
   0xd   :  { %911 = dma.done.wait [#allocation6], 1024  }
   0xe   :  { %912 = vsyncadd [#allocation6], 4294966272  ;;  %v73_v0 = vld [vmem:[#allocation5 + $0x18] sm:$0xff]  ;;  %v72_v1 = vld [vmem:[#allocation5 + $0x10] sm:$0xff]  ;;  %vm78_vm0 = vcmask 261120   ;;  %s920_s9 = smov 88  }
   0xf   :  { %97 = vmatpush.msra.mxu0 %v73_v0  ;;  %v71_v2 = vld [vmem:[#allocation5 + $0x8] sm:$0xff]  ;;  %v70_v3 = vld [vmem:[#allocation5] sm:$0xff]  ;;  %v68_v4 = vld [vmem:[#allocation2] sm:$0xff]  ;;  %s921_s10 = smov 96   ;;  %s922_s11 = smov 80   ;;  %vm113_vm1 = vcmask 64512  }
  0x10   :  { %v69_v5 = vld [vmem:[#allocation2 + $0x8] sm:$0xff]  ;;  %v779_v6 = vld [vmem:[%s1094_s2] ss:$0 sm:$0xff]  ;;  %s923_s2 = smov 120   ;;  %s924_s12 = smov 72   ;;  %vm657_vm2 = vcmask 130048  }
  0x11   :  { %98 = vmatpush.msra.mxu0 %v72_v1  ;;  %s925_s13 = smov 112   ;;  %s926_s14 = smov 104   ;;  %vm660_vm3 = vcmask 195584  }
  0x12   :  { %s927_s15 = smov 56   ;;  %s928_s16 = smov 64  }
  0x13   :  { %99 = vmatpush.msra.mxu0 %v71_v2  ;;  %s929_s17 = smov 48   ;;  %s930_s18 = smov 40  }
  0x14   :  { %s931_s19 = smov 16   ;;  %s932_s20 = smov 24  }
  0x15   :  { %100 = vmatpush.msra.mxu0 %v70_v3  ;;  %s933_s23 = smov [#allocation8]   ;;  %s708_s29 = sshll.u32 %s1097_s5, 4  ;;  %s709_s29 = int_to_ptr.hbm [resolvable:$true] %s708_s29 }
  0x16   :  { %722 = vmatmul.msk.f32.vlgmr.msra.gmra.mxu0 %vm78_vm0, %v68_v4  ;;  %s706_s24 = sshll.u32 %s933_s23, 4  ;;  %s707_s24 = int_to_ptr.vmem [resolvable:$true] %s706_s24 }
  0x1e   :  { %723 = vmatmul.msk.f32.gmra.mxu0 %vm78_vm0, %v69_v5 }
  0x93   :  { %v102_v7 = vpop.f32.mrf.mxu0 }
  0x94   :  { %v987_v8 = vadd.f32 %v779_v6, %v102_v7 }
  0x96   :  { %243 = vrot.lane.b32.xlu2 %v987_v8, %s920_s9  ;;  %111 = vrot.lane.b32.xlu0 %v987_v8, %s921_s10  ;;  %v108_v12 = vmul.f32 0.35355338, %v987_v8 }
  0x9b   :  { %v105_v9 = vpop.f32.mrf.mxu0 }
  0x9c   :  { %v991_v10 = vadd.f32 %v779_v6, %v105_v9 }
  0x9e   :  { %271 = vrot.lane.b32.xlu1 %v991_v10, %s920_s9  ;;  %373 = vrot.lane.b32.xlu2 %v987_v8, %s922_s11  ;;  %v109_v11 = vmul.f32 0.35355338, %v991_v10  ;;  %v774_v37 = vpack.i.bf16 %v991_v10, %v987_v8 }
  0x9f   :  { %140 = vrot.lane.b32.xlu0 %v991_v10, %s921_s10 }
  0xa6   :  { %269 = vrot.lane.b32.xlu1 %v109_v11, %s923_s2  ;;  %503 = vrot.lane.b32.xlu2 %v987_v8, %s924_s12 }
  0xa7   :  { %241 = vrot.lane.b32.xlu0 %v108_v12, %s923_s2 }
  0xae   :  { %399 = vrot.lane.b32.xlu2 %v109_v11, %s925_s13  ;;  %371 = vrot.lane.b32.xlu1 %v108_v12, %s925_s13 }
  0xaf   :  { %501 = vrot.lane.b32.xlu0 %v108_v12, %s926_s14 }
  0xb6   :  { %401 = vrot.lane.b32.xlu1 %v991_v10, %s922_s11 }
  0xb7   :  { %531 = vrot.lane.b32.xlu0 %v991_v10, %s924_s12 }
  0xbe   :  { %529 = vrot.lane.b32.xlu1 %v109_v11, %s926_s14 }
  0xf0   :  { %v244_v13 = vpop.permute.xlu2 %243 }
  0xf8   :  { %v374_v15 = vpop.permute.xlu2 %373 }
 0x100   :  { %v504_v19 = vpop.permute.xlu2 %503 }
 0x108   :  { %v112_v14 = vpop.permute.xlu0 %111  ;;  %v400_v25 = vpop.permute.xlu2 %399 }
 0x109   :  { %724 = vmatpush.xpose.msk.msra.mxu1 %vm113_vm1, %v112_v14 }
 0x10c   :  { %725 = vmatmul.msk.f32.vlgmr.msra.gmra.mxu1 %vm113_vm1, %v108_v12 }
 0x10d   :  { %730 = vmatpush.xpose.msk.msrb.mxu1 %vm113_vm1, %v244_v13 }
 0x110   :  { %v272_v16 = vpop.permute.xlu1 %271 }
 0x111   :  { %v141_v17 = vpop.permute.xlu0 %140  ;;  %732 = vmatpush.xpose.msk.msra.mxu2 %vm113_vm1, %v272_v16 }
 0x112   :  { %726 = vmatpush.xpose.msk.msrb.mxu0 %vm113_vm1, %v141_v17 }
 0x115   :  { %736 = vmatpush.xpose.msk.msrb.mxu2 %vm113_vm1, %v374_v15  ;;  %727 = vmatmul.msk.f32.vlgmr.msrb.gmra.mxu0 %vm113_vm1, %v109_v11 }
 0x118   :  { %v270_v18 = vpop.permute.xlu1 %269 }
 0x119   :  { %v242_v20 = vpop.permute.xlu0 %241  ;;  %733 = vmatmul.msk.f32.vlgmr.msra.gmra.mxu2 %vm113_vm1, %v270_v18 }
 0x11a   :  { %731 = vmatmul.msk.f32.vlgmr.msrb.gmra.mxu1 %vm113_vm1, %v242_v20  ;;  %742 = vmatpush.xpose.msk.msra.mxu2 %vm113_vm1, %v504_v19 }
 0x120   :  { %v372_v21 = vpop.permute.xlu1 %371 }
 0x121   :  { %v502_v22 = vpop.permute.xlu0 %501  ;;  %737 = vmatmul.msk.f32.vlgmr.msrb.gmra.mxu2 %vm113_vm1, %v372_v21 }
 0x128   :  { %v402_v23 = vpop.permute.xlu1 %401 }
 0x129   :  { %v532_v24 = vpop.permute.xlu0 %531  ;;  %738 = vmatpush.xpose.msk.msra.mxu0 %vm113_vm1, %v402_v23  ;;  %743 = vmatmul.msk.f32.vlgmr.msra.gmra.mxu2 %vm113_vm1, %v502_v22 }
 0x12c   :  { %739 = vmatmul.msk.f32.vlgmr.msra.gmra.mxu0 %vm113_vm1, %v400_v25 }
 0x12d   :  { %744 = vmatpush.xpose.msk.msrb.mxu0 %vm113_vm1, %v532_v24 }
 0x130   :  { %v530_v26 = vpop.permute.xlu1 %529 }
 0x134   :  { %745 = vmatmul.msk.f32.vlgmr.msrb.gmra.mxu0 %vm113_vm1, %v530_v26 }
 0x189   :  { %v136_v27 = vpop.f32.mrf.mxu1 }
 0x18a   :  { %v167_v28 = vsel %vm113_vm1, %v136_v27, -inf }
 0x18b   :  { %168 = vmax.xlane.f32.xlu2 %v167_v28 }
 0x192   :  { %v164_v29 = vpop.f32.mrf.mxu0 }
 0x193   :  { %v170_v30 = vsel %vm113_vm1, %v164_v29, -inf }
 0x194   :  { %171 = vmax.xlane.f32.xlu0 %v170_v30 }
 0x197   :  { %v1019_v31 = vpop.f32.mrf.mxu1 }
 0x198   :  { %v297_v32 = vsel %vm113_vm1, %v1019_v31, -inf }
 0x199   :  { %298 = vmax.xlane.f32.xlu1 %v297_v32 }
 0x19c   :  { %v294_v33 = vpop.f32.mrf.mxu2 }
 0x19d   :  { %v300_v34 = vsel %vm113_vm1, %v294_v33, -inf }
 0x19e   :  { %301 = vmax.xlane.f32.xlu2 %v300_v34 }
 0x1a4   :  { %v396_v35 = vpop.f32.mrf.mxu2 }
 0x1a5   :  { %v427_v36 = vsel %vm113_vm1, %v396_v35, -inf }
 0x1a6   :  { %428 = vmax.xlane.f32.xlu2 %v427_v36 }
 0x1a8   :  { %775 = vrot.lane.b32.xlu0 %v774_v37, %s927_s15 }
 0x1a9   :  { %v424_v38 = vpop.f32.mrf.mxu0 }
 0x1aa   :  { %v430_v39 = vsel %vm113_vm1, %v424_v38, -inf }
 0x1ab   :  { %431 = vmax.xlane.f32.xlu1 %v430_v39 }
 0x1ac   :  { %v526_v40 = vpop.f32.mrf.mxu2 }
 0x1ad   :  { %v557_v41 = vsel %vm113_vm1, %v526_v40, -inf }
 0x1b1   :  { %v1029_v42 = vpop.f32.mrf.mxu0 }
 0x1b2   :  { %v560_v43 = vsel %vm113_vm1, %v1029_v42, -inf }
 0x1be   :  { %770 = vrot.lane.b32.xlu2 %v774_v37, %s928_s16 }
 0x1d2   :  { %558 = vmax.xlane.f32.xlu0 %v557_v41 }
 0x1e7   :  { %561 = vmax.xlane.f32.xlu2 %v560_v43 }
 0x1fe   :  { %v169_v44 = vpop.xlane.xlu2 %168 }
 0x1ff   :  { %v173_v45 = vsub.f32 %v136_v27, %v169_v44  ;;  %449 = vrot.lane.b32.xlu2 %v987_v8, %s929_s17 }
 0x201   :  { %v175_v46 = vmul.f32 1.442695, %v173_v45 }
 0x203   :  { %781 = vpow2.f32 %v175_v46 }
 0x207   :  { %v172_v47 = vpop.xlane.xlu0 %171 }
 0x208   :  { %v174_v48 = vsub.f32 %v164_v29, %v172_v47 }
 0x209   :  { %v1035_v49 = vpop.eup %781 }
 0x20a   :  { %v177_v50 = vmul.f32 1.442695, %v174_v48  ;;  %v179_v51 = vsel %vm113_vm1, %v1035_v49, 0.0 }
 0x20b   :  { %180 = vadd.xlane.f32.xlu0 %v179_v51 }
 0x20c   :  { %783 = vpow2.f32 %v177_v50  ;;  %v299_v57 = vpop.xlane.xlu1 %298 }
 0x211   :  { %v302_v52 = vpop.xlane.xlu2 %301 }
 0x212   :  { %v1039_v53 = vpop.eup %783  ;;  %v304_v54 = vsub.f32 %v294_v33, %v302_v52 }
 0x213   :  { %v182_v55 = vsel %vm113_vm1, %v1039_v53, 0.0 }
 0x214   :  { %v307_v56 = vmul.f32 1.442695, %v304_v54  ;;  %183 = vadd.xlane.f32.xlu1 %v182_v55 }
 0x216   :  { %785 = vpow2.f32 %v307_v56 }
 0x219   :  { %v429_v58 = vpop.xlane.xlu2 %428 }
 0x21a   :  { %v776_v59 = vpop.permute.xlu0 %775  ;;  %v433_v1 = vsub.f32 %v396_v35, %v429_v58 }
 0x21b   :  { %v778_v60 = vunpack.i.h.bf16 %v776_v59  ;;  %v777_v29 = vunpack.i.l.bf16 %v776_v59 }
 0x21c   :  { %v1043_v61 = vpop.eup %785  ;;  %v435_v6 = vmul.f32 1.442695, %v433_v1  ;;  %v663_v1 = vld [vmem:[#allocation7] sm:$0xff] }
 0x21d   :  { %366 = vmatpush.msra.mxu1 %v778_v60  ;;  %v312_v62 = vsel %vm113_vm1, %v1043_v61, 0.0 }
 0x21e   :  { %v432_v63 = vpop.xlane.xlu1 %431  ;;  %313 = vadd.xlane.f32.xlu1 %v312_v62  ;;  %v666_v62 = vld [vmem:[#allocation7 + $0x18] sm:$0xff] }
 0x21f   :  { %v434_v0 = vsub.f32 %v424_v38, %v432_v63  ;;  %579 = vrot.lane.b32.xlu0 %v987_v8, %s930_s18  ;;  %v303_v8 = vsub.f32 %v1019_v31, %v299_v57  ;;  %v665_v63 = vld [vmem:[#allocation7 + $0x10] sm:$0xff]  ;;  %689 = vmatpush.msrb.mxu2 %v666_v62 }
 0x221   :  { %v437_v2 = vmul.f32 1.442695, %v434_v0  ;;  %v771_v3 = vpop.permute.xlu2 %770  ;;  %v305_v13 = vmul.f32 1.442695, %v303_v8  ;;  %v664_v0 = vld [vmem:[#allocation7 + $0x8] sm:$0xff]  ;;  %690 = vmatpush.msrb.mxu2 %v665_v63 }
 0x222   :  { %v772_v4 = vunpack.i.l.bf16 %v771_v3  ;;  %v773_v5 = vunpack.i.h.bf16 %v771_v3 }
 0x223   :  { %787 = vpow2.f32 %v437_v2  ;;  %691 = vmatpush.msrb.mxu2 %v664_v0 }
 0x224   :  { %210 = vmatpush.msra.mxu3 %v772_v4  ;;  %789 = vpow2.f32 %v435_v6 }
 0x225   :  { %791 = vpow2.f32 %v305_v13  ;;  %692 = vmatpush.msrb.mxu2 %v663_v1 }
 0x226   :  { %236 = vmatpush.msrb.mxu3 %v773_v5 }
 0x229   :  { %v1049_v7 = vpop.eup %787 }
 0x22a   :  { %v442_v9 = vsel %vm113_vm1, %v1049_v7, 0.0  ;;  %v790_v11 = vpop.eup %789 }
 0x22b   :  { %443 = vadd.xlane.f32.xlu1 %v442_v9  ;;  %v439_v12 = vsel %vm113_vm1, %v790_v11, 0.0  ;;  %v792_v14 = vpop.eup %791 }
 0x22c   :  { %v309_v18 = vsel %vm113_vm1, %v792_v14, 0.0 }
 0x233   :  { %440 = vadd.xlane.f32.xlu1 %v439_v12 }
 0x245   :  { %v559_v15 = vpop.xlane.xlu0 %558 }
 0x246   :  { %v563_v16 = vsub.f32 %v526_v40, %v559_v15  ;;  %v780_v15 = vld [vmem:[%s1096_s4] ss:$0 sm:$0xff] }
 0x248   :  { %v565_v17 = vmul.f32 1.442695, %v563_v16 }
 0x249   :  { %310 = vadd.xlane.f32.xlu0 %v309_v18 }
 0x24a   :  { %793 = vpow2.f32 %v565_v17 }
 0x250   :  { %v794_v19 = vpop.eup %793 }
 0x251   :  { %v569_v20 = vsel %vm113_vm1, %v794_v19, 0.0 }
 0x252   :  { %570 = vadd.xlane.f32.xlu1 %v569_v20 }
 0x25a   :  { %v562_v21 = vpop.xlane.xlu2 %561 }
 0x25b   :  { %v564_v22 = vsub.f32 %v1029_v42, %v562_v21 }
 0x25d   :  { %v567_v23 = vmul.f32 1.442695, %v564_v22  ;;  %605 = vrot.lane.b32.xlu0 %v991_v10, %s930_s18 }
 0x25f   :  { %795 = vpow2.f32 %v567_v23 }
 0x262   :  { %v450_v33 = vpop.permute.xlu2 %449 }
 0x265   :  { %v796_v24 = vpop.eup %795 }
 0x266   :  { %v572_v25 = vsel %vm113_vm1, %v796_v24, 0.0 }
 0x267   :  { %573 = vadd.xlane.f32.xlu2 %v572_v25 }
 0x26b   :  { %475 = vrot.lane.b32.xlu1 %v991_v10, %s929_s17 }
 0x27e   :  { %v181_v26 = vpop.xlane.xlu0 %180 }
 0x27f   :  { %797 = vrcp.f32 %v181_v26 }
 0x285   :  { %v798_v27 = vpop.eup %797 }
 0x286   :  { %v187_v28 = vmul.f32 %v798_v27, %v1035_v49 }
 0x287   :  { %v184_v30 = vpop.xlane.xlu1 %183 }
 0x288   :  { %799 = vrcp.f32 %v184_v30  ;;  %728 = vmatmul.msk.f32.vlgmr.msra.gmra.mxu3 %vm113_vm1, %v187_v28 }
 0x289   :  { %340 = vmatpush.msra.mxu3 %v777_v29 }
 0x28e   :  { %v800_v31 = vpop.eup %799 }
 0x28f   :  { %v188_v32 = vmul.f32 %v800_v31, %v1039_v53 }
 0x291   :  { %729 = vmatmul.msk.f32.vlgmr.msrb.gmra.mxu3 %vm113_vm1, %v188_v32  ;;  %v314_v34 = vpop.xlane.xlu1 %313  ;;  %v580_v36 = vpop.permute.xlu0 %579 }
 0x292   :  { %470 = vmatpush.msrb.mxu3 %v450_v33  ;;  %801 = vrcp.f32 %v314_v34 }
 0x298   :  { %v802_v10 = vpop.eup %801 }
 0x299   :  { %v318_v35 = vmul.f32 %v802_v10, %v1043_v61 }
 0x29b   :  { %735 = vmatmul.msk.f32.vlgmr.msra.gmra.mxu1 %vm113_vm1, %v318_v35 }
 0x29e   :  { %v444_v37 = vpop.xlane.xlu1 %443 }
 0x2a6   :  { %v441_v39 = vpop.xlane.xlu1 %440 }
 0x2bc   :  { %v311_v38 = vpop.xlane.xlu0 %310 }
 0x2bd   :  { %803 = vrcp.f32 %v311_v38 }
 0x2be   :  { %805 = vrcp.f32 %v441_v39 }
 0x2c3   :  { %v804_v40 = vpop.eup %803 }
 0x2c4   :  { %v317_v41 = vmul.f32 %v804_v40, %v792_v14  ;;  %v806_v43 = vpop.eup %805 }
 0x2c5   :  { %v571_v42 = vpop.xlane.xlu1 %570  ;;  %v447_v44 = vmul.f32 %v806_v43, %v790_v11 }
 0x2c6   :  { %734 = vmatmul.msk.f32.vlgmr.msra.gmra.mxu3 %vm113_vm1, %v317_v41  ;;  %807 = vrcp.f32 %v571_v42 }
 0x2c7   :  { %600 = vmatpush.msra.mxu3 %v580_v36  ;;  %809 = vrcp.f32 %v444_v37 }
 0x2cc   :  { %v808_v45 = vpop.eup %807 }
 0x2cd   :  { %v577_v46 = vmul.f32 %v808_v45, %v794_v19  ;;  %v810_v47 = vpop.eup %809 }
 0x2ce   :  { %740 = vmatmul.msk.f32.vlgmr.msrb.gmra.mxu3 %vm113_vm1, %v447_v44  ;;  %v448_v49 = vmul.f32 %v810_v47, %v1049_v7 }
 0x2cf   :  { %v606_v51 = vpop.permute.xlu0 %605 }
 0x2d6   :  { %746 = vmatmul.msk.f32.vlgmr.msra.gmra.mxu3 %vm113_vm1, %v577_v46 }
 0x2da   :  { %v574_v48 = vpop.xlane.xlu2 %573 }
 0x2db   :  { %811 = vrcp.f32 %v574_v48 }
 0x2dd   :  { %v476_v50 = vpop.permute.xlu1 %475 }
 0x2de   :  { %496 = vmatpush.msrb.mxu1 %v476_v50 }
 0x2df   :  { %741 = vmatmul.msk.f32.vlgmr.msrb.gmra.mxu1 %vm113_vm1, %v448_v49 }
 0x2e0   :  { %626 = vmatpush.msra.mxu1 %v606_v51 }
 0x2e1   :  { %v812_v52 = vpop.eup %811 }
 0x2e2   :  { %v578_v53 = vmul.f32 %v812_v52, %v796_v24 }
 0x2e7   :  { %747 = vmatmul.msk.f32.vlgmr.msra.gmra.mxu1 %vm113_vm1, %v578_v53 }
 0x30b   :  { %v212_v54 = vpop.f32.mrf.mxu3 }
 0x314   :  { %v238_v55 = vpop.f32.mrf.mxu3 }
 0x318   :  { %v368_v58 = vpop.f32.mrf.mxu1 }
 0x349   :  { %v342_v56 = vpop.f32.mrf.mxu3 }
 0x34a   :  { %633 = vrot.lane.b32.xlu0 %v342_v56, %s917_s27 }
 0x351   :  { %v472_v57 = vpop.f32.mrf.mxu3 }
 0x352   :  { %641 = vrot.lane.b32.xlu0 %v472_v57, %s931_s19 }
 0x359   :  { %v602_v59 = vpop.f32.mrf.mxu3 }
 0x35a   :  { %635 = vrot.lane.b32.xlu0 %v368_v58, %s917_s27  ;;  %649 = vrot.lane.b32.xlu1 %v602_v59, %s932_s20 }
 0x35c   :  { %v498_v60 = vpop.f32.mrf.mxu1 }
 0x362   :  { %643 = vrot.lane.b32.xlu1 %v498_v60, %s931_s19 }
 0x364   :  { %v628_v61 = vpop.f32.mrf.mxu1 }
 0x365   :  { %651 = vrot.lane.b32.xlu0 %v628_v61, %s932_s20 }
 0x3bc   :  { %v634_v2 = vpop.permute.xlu0 %633 }
 0x3bd   :  { %v655_v4 = vsel %vm113_vm1, %v212_v54, %v634_v2 }
 0x3c4   :  { %v642_v3 = vpop.permute.xlu0 %641 }
 0x3c5   :  { %v658_v5 = vsel %vm657_vm2, %v655_v4, %v642_v3 }
 0x3cc   :  { %v650_v6 = vpop.permute.xlu1 %649  ;;  %v636_v9 = vpop.permute.xlu0 %635 }
 0x3cd   :  { %v661_v7 = vsel %vm660_vm3, %v658_v5, %v650_v6  ;;  %v656_v11 = vsel %vm113_vm1, %v238_v55, %v636_v9 }
 0x3ce   :  { %748 = vmatmul.msk.f32.vlgmr.msrb.gmra.mxu2 %vm78_vm0, %v661_v7 }
 0x3d4   :  { %v644_v12 = vpop.permute.xlu1 %643 }
 0x3d5   :  { %v659_v8 = vsel %vm657_vm2, %v656_v11, %v644_v12 }
 0x3d7   :  { %v652_v13 = vpop.permute.xlu0 %651 }
 0x3d8   :  { %v662_v14 = vsel %vm660_vm3, %v659_v8, %v652_v13 }
 0x3d9   :  { %749 = vmatmul.msk.f32.gmra.mxu2 %vm78_vm0, %v662_v14 }
 0x451   :  { %v694_v16 = vpop.f32.mrf.mxu2 }
 0x452   :  { %v695_v17 = vadd.f32 %v780_v15, %v694_v16 }
 0x454   :  { %700 = vst.msk [vmem:[#allocation8] sm:$0xff] %vm78_vm0, %v695_v17 }
 0x45c   :  { %v697_v18 = vpop.f32.mrf.mxu2 }
 0x45d   :  { %v698_v19 = vadd.f32 %v780_v15, %v697_v18 }
 0x45f   :  { %701 = vst.msk [vmem:[#allocation8 + $0x8] sm:$0xff] %vm78_vm0, %v698_v19 }
 0x460   :  { %714 = dma.vmem_to_hbm [thread:$0]  %s707_s24, 256, %s709_s29, [#allocation4], %s916_s26, %s916_s26, %s917_s27  }
 0x461   :  { %913 = dma.done.wait [#allocation4], 256  }
 0x462   :  { %914 = vsyncadd [#allocation4], 4294967040 }
 0x463   :  { %719 = vsyncpa [#allocation3], 1 }
 0x464   :  { %720 = vsyncpa [#allocation6], 1 }
 0x465   :  { %721 = vsyncpa [#allocation4], 1 }

</bundles_post_ra>
